<compile_context>
chip_gen: v5e
topology: v5e:2x2
jax: 0.10.0
libtpu: 0.0.40
codegen_flags: <defaults>
</compile_context>

<pallas_src>
import functools

import jax
import jax.numpy as jnp
from jax.experimental import pallas as pl
from jax.experimental.pallas import tpu as pltpu

LANE = 128
SUBLANE = 8


def _round_up(x, m):
    return (x + m - 1) // m * m


def mlp_kernel(x_ref, w1_ref, b1_ref, w2_ref, b2_ref, o_ref):
    # hidden = relu(x @ W1 + b1) — MXU matmul with f32 accumulation,
    # f32 bias-add + ReLU epilogue on the VPU.
    h = jnp.dot(x_ref[...], w1_ref[...], preferred_element_type=jnp.float32)
    h = jnp.maximum(h + b1_ref[...], 0.0)
    # out = h @ W2 + b2 (cast hidden back to the weight dtype for the MXU).
    o = jnp.dot(h.astype(w2_ref.dtype), w2_ref[...],
                preferred_element_type=jnp.float32)
    o_ref[...] = (o + b2_ref[...]).astype(o_ref.dtype)


def prepare_params(w1, b1, w2, b2, param_dtype=jnp.float32):
    """One-time parameter prep (outside the hot path).

    Takes PyTorch-nn.Linear-layout params: w1 [H, I], b1 [H], w2 [O, H], b2 [O].
    Returns MXU-friendly, lane-padded params:
      w1_t [I_p, H_p], b1_p [1, H_p] (f32), w2_t [H_p, O_p], b2_p [1, O_p] (f32)
    plus the logical (in, hidden, out) sizes. Zero padding is inert through the
    matmul/ReLU chain.
    """
    hidden, in_size = w1.shape
    out_size = w2.shape[0]
    in_p = _round_up(in_size, LANE)
    hid_p = _round_up(hidden, LANE)
    out_p = _round_up(out_size, LANE)

    w1_t = jnp.zeros((in_p, hid_p), param_dtype).at[:in_size, :hidden].set(
        w1.T.astype(param_dtype))
    w2_t = jnp.zeros((hid_p, out_p), param_dtype).at[:hidden, :out_size].set(
        w2.T.astype(param_dtype))
    # Biases kept in f32: the epilogue (bias add + ReLU) is f32 on every chip.
    b1_p = jnp.zeros((1, hid_p), jnp.float32).at[0, :hidden].set(
        b1.astype(jnp.float32))
    b2_p = jnp.zeros((1, out_p), jnp.float32).at[0, :out_size].set(
        b2.astype(jnp.float32))
    return w1_t, b1_p, w2_t, b2_p, (in_size, hidden, out_size)


@functools.partial(jax.jit, static_argnames=("dims", "tile_b"))
def mlp_forward(x, w1_t, b1_p, w2_t, b2_p, *, dims, tile_b=128):
    """x: (B, in). Params as returned by prepare_params. Returns (B, out)."""
    in_size, hidden, out_size = dims
    B = x.shape[0]
    in_p, hid_p = w1_t.shape
    out_p = w2_t.shape[1]
    param_dtype = w1_t.dtype
    out_dtype = x.dtype

    # Batch tile: >= 8 sublanes; don't over-pad tiny batches, cap at tile_b.
    tile_b = max(SUBLANE, min(tile_b, _round_up(B, SUBLANE)))
    b_pad = _round_up(B, tile_b)

    # Pad batch rows + input lanes with zeros (inert), cast to param dtype.
    x_p = jnp.zeros((b_pad, in_p), param_dtype).at[:B, :in_size].set(
        x.astype(param_dtype))

    # VMEM budget: double-buffered x/out tiles + resident weights/biases
    # + f32 intermediates, with 2x headroom (stay under v7x's 64 MiB).
    pbytes = jnp.dtype(param_dtype).itemsize
    obytes = jnp.dtype(out_dtype).itemsize
    vmem_est = (
        2 * tile_b * in_p * pbytes          # double-buffered x tile
        + 2 * tile_b * out_p * obytes       # double-buffered out tile
        + (in_p * hid_p + hid_p * out_p) * pbytes   # resident W1, W2
        + (hid_p + out_p) * 4                        # resident biases (f32)
        + tile_b * (hid_p + out_p) * 4               # f32 intermediates
    )
    vmem_limit = int(min(max(2 * vmem_est, 32 * 1024 * 1024), 60 * 1024 * 1024))

    grid = (b_pad // tile_b,)
    out_padded = pl.pallas_call(
        mlp_kernel,
        grid=grid,
        in_specs=[
            # x: tiled over batch, lane-dense input dim.
            pl.BlockSpec((tile_b, in_p), lambda i: (i, 0),
                         memory_space=pltpu.MemorySpace.VMEM),
            # Weights/biases: constant block index -> DMA'd once, VMEM-resident.
            pl.BlockSpec((in_p, hid_p), lambda i: (0, 0),
                         memory_space=pltpu.MemorySpace.VMEM),
            pl.BlockSpec((1, hid_p), lambda i: (0, 0),
                         memory_space=pltpu.MemorySpace.VMEM),
            pl.BlockSpec((hid_p, out_p), lambda i: (0, 0),
                         memory_space=pltpu.MemorySpace.VMEM),
            pl.BlockSpec((1, out_p), lambda i: (0, 0),
                         memory_space=pltpu.MemorySpace.VMEM),
        ],
        out_specs=pl.BlockSpec((tile_b, out_p), lambda i: (i, 0),
                               memory_space=pltpu.MemorySpace.VMEM),
        out_shape=jax.ShapeDtypeStruct((b_pad, out_p), out_dtype),
        compiler_params=pltpu.CompilerParams(
            dimension_semantics=("parallel",),
            vmem_limit_bytes=vmem_limit,
        ),
    )(x_p, w1_t, b1_p, w2_t, b2_p)

    return out_padded[:B, :out_size]


if __name__ == "__main__":
    # Shapes consistent with MLP(input_size, hidden_size, output_size).
    input_size, hidden_size, output_size = 32, 64, 16

    key = jax.random.PRNGKey(0)
    kx, kx2, kw1, kb1, kw2, kb2 = jax.random.split(key, 6)

    # PyTorch nn.Linear layouts: W [out, in], b [out].
    w1 = jax.random.normal(kw1, (hidden_size, input_size), jnp.float32) * 0.1
    b1 = jax.random.normal(kb1, (hidden_size,), jnp.float32) * 0.1
    w2 = jax.random.normal(kw2, (output_size, hidden_size), jnp.float32) * 0.1
    b2 = jax.random.normal(kb2, (output_size,), jnp.float32) * 0.1

    def ref_fn(x):
        return jnp.maximum(x @ w1.T + b1, 0.0) @ w2.T + b2

    # --- f32 path, tiny batch (single grid step) ---
    x_small = jax.random.normal(kx, (8, input_size), jnp.float32)
    params_f32 = prepare_params(w1, b1, w2, b2, param_dtype=jnp.float32)
    *p32, dims = params_f32
    out_small = jax.block_until_ready(mlp_forward(x_small, *p32, dims=dims))
    assert out_small.shape == (8, output_size)
    assert jnp.allclose(out_small, ref_fn(x_small), atol=1e-4, rtol=1e-4)

    # --- f32 path, larger batch exercising the batch grid + padding ---
    x_big = jax.random.normal(kx2, (200, input_size), jnp.float32)
    out_big = jax.block_until_ready(mlp_forward(x_big, *p32, dims=dims))
    assert out_big.shape == (200, output_size)
    assert jnp.allclose(out_big, ref_fn(x_big), atol=1e-4, rtol=1e-4)

    # --- bf16 weights/activations with f32 accumulation (v6e/v7x MXU path) ---
    params_bf16 = prepare_params(w1, b1, w2, b2, param_dtype=jnp.bfloat16)
    *pbf, dims_bf = params_bf16
    out_bf = jax.block_until_ready(mlp_forward(x_big, *pbf, dims=dims_bf))
    assert out_bf.shape == (200, output_size)
    assert out_bf.dtype == jnp.float32
    assert jnp.allclose(out_bf, ref_fn(x_big), atol=5e-2, rtol=5e-2)

    print("KERNEL_OK")
</pallas_src>

<mosaic_0001>
module attributes {stable_mosaic.version = 11 : i64} {
  func.func @mlp_kernel(%arg0: i32, %arg1: memref<8x128xf32, #tpu.memory_space<vmem>>, %arg2: memref<128x128xf32, #tpu.memory_space<vmem>>, %arg3: memref<1x128xf32, #tpu.memory_space<vmem>>, %arg4: memref<128x128xf32, #tpu.memory_space<vmem>>, %arg5: memref<1x128xf32, #tpu.memory_space<vmem>>, %arg6: memref<8x128xf32, #tpu.memory_space<vmem>>) attributes {dimension_semantics = [#tpu.dimension_semantics<parallel>], iteration_bounds = array<i64: 1>, scalar_prefetch = 0 : i64, scratch_operands = 0 : i64, tpu.core_type = #tpu.core_type<tc>, window_params = [{transform_indices = @transform_0, window_bounds = array<i64: 8, 128>}, {pipeline_mode = #tpu.pipeline_mode<synchronous>, transform_indices = @transform_1, window_bounds = array<i64: 128, 128>}, {pipeline_mode = #tpu.pipeline_mode<synchronous>, transform_indices = @transform_2, window_bounds = array<i64: 1, 128>}, {pipeline_mode = #tpu.pipeline_mode<synchronous>, transform_indices = @transform_3, window_bounds = array<i64: 128, 128>}, {pipeline_mode = #tpu.pipeline_mode<synchronous>, transform_indices = @transform_4, window_bounds = array<i64: 1, 128>}, {transform_indices = @transform_5, window_bounds = array<i64: 8, 128>}]} {
    %c0 = arith.constant 0 : index
    %c0_0 = arith.constant 0 : index
    %0 = vector.load %arg1[%c0, %c0_0] : memref<8x128xf32, #tpu.memory_space<vmem>>, vector<8x128xf32>
    %c0_1 = arith.constant 0 : index
    %c0_2 = arith.constant 0 : index
    %1 = vector.load %arg2[%c0_1, %c0_2] : memref<128x128xf32, #tpu.memory_space<vmem>>, vector<128x128xf32>
    %cst = arith.constant dense<0.000000e+00> : vector<8x128xf32>
    %2 = tpu.matmul %0, %1, %cst {dimension_numbers = #tpu.dot_dimension_numbers<[1], [0], [0], [1], [0, 0, 1, 1], [], []>} : vector<8x128xf32>, vector<128x128xf32>, vector<8x128xf32> -> vector<8x128xf32>
    %c0_3 = arith.constant 0 : index
    %c0_4 = arith.constant 0 : index
    %3 = vector.load %arg3[%c0_3, %c0_4] : memref<1x128xf32, #tpu.memory_space<vmem>>, vector<1x128xf32>
    %4 = vector.broadcast %3 : vector<1x128xf32> to vector<8x128xf32>
    %5 = arith.addf %2, %4 : vector<8x128xf32>
    %cst_5 = arith.constant 0.000000e+00 : f32
    %6 = vector.broadcast %cst_5 : f32 to vector<8x128xf32>
    %7 = arith.maximumf %5, %6 : vector<8x128xf32>
    %c0_6 = arith.constant 0 : index
    %c0_7 = arith.constant 0 : index
    %8 = vector.load %arg4[%c0_6, %c0_7] : memref<128x128xf32, #tpu.memory_space<vmem>>, vector<128x128xf32>
    %cst_8 = arith.constant dense<0.000000e+00> : vector<8x128xf32>
    %9 = tpu.matmul %7, %8, %cst_8 {dimension_numbers = #tpu.dot_dimension_numbers<[1], [0], [0], [1], [0, 0, 1, 1], [], []>} : vector<8x128xf32>, vector<128x128xf32>, vector<8x128xf32> -> vector<8x128xf32>
    %c0_9 = arith.constant 0 : index
    %c0_10 = arith.constant 0 : index
    %10 = vector.load %arg5[%c0_9, %c0_10] : memref<1x128xf32, #tpu.memory_space<vmem>>, vector<1x128xf32>
    %11 = vector.broadcast %10 : vector<1x128xf32> to vector<8x128xf32>
    %12 = arith.addf %9, %11 : vector<8x128xf32>
    %c0_11 = arith.constant 0 : index
    %c0_12 = arith.constant 0 : index
    %13 = vector.load %arg6[%c0_11, %c0_12] : memref<8x128xf32, #tpu.memory_space<vmem>>, vector<8x128xf32>
    tpu.vector_store %arg6[%c0_11, %c0_12], %12 {strides = array<i32>} : memref<8x128xf32, #tpu.memory_space<vmem>>, vector<8x128xf32>,
    return
  }
  func.func @transform_0(%arg0: i32) -> (i32, i32) {
    %c0_i32 = arith.constant 0 : i32
    %c0_i32_0 = arith.constant 0 : i32
    return %arg0, %c0_i32 : i32, i32
  }
  func.func @transform_1(%arg0: i32) -> (i32, i32) {
    %c0_i32 = arith.constant 0 : i32
    %c0_i32_0 = arith.constant 0 : i32
    %c0_i32_1 = arith.constant 0 : i32
    return %c0_i32, %c0_i32_0 : i32, i32
  }
  func.func @transform_2(%arg0: i32) -> (i32, i32) {
    %c0_i32 = arith.constant 0 : i32
    %c0_i32_0 = arith.constant 0 : i32
    %c0_i32_1 = arith.constant 0 : i32
    return %c0_i32, %c0_i32_0 : i32, i32
  }
  func.func @transform_3(%arg0: i32) -> (i32, i32) {
    %c0_i32 = arith.constant 0 : i32
    %c0_i32_0 = arith.constant 0 : i32
    %c0_i32_1 = arith.constant 0 : i32
    return %c0_i32, %c0_i32_0 : i32, i32
  }
  func.func @transform_4(%arg0: i32) -> (i32, i32) {
    %c0_i32 = arith.constant 0 : i32
    %c0_i32_0 = arith.constant 0 : i32
    %c0_i32_1 = arith.constant 0 : i32
    return %c0_i32, %c0_i32_0 : i32, i32
  }
  func.func @transform_5(%arg0: i32) -> (i32, i32) {
    %c0_i32 = arith.constant 0 : i32
    %c0_i32_0 = arith.constant 0 : i32
    return %arg0, %c0_i32 : i32, i32
  }
}

</mosaic_0001>

<bundles_post_ra>
// kernel: mlp_forward.1
= control target key start
LH: loop header
LB: loop body
LE: loop exit
PB: predicated region body
PF: predicated region fallthrough
CT: control target
= control target key end

     0   :  { %10 = vsyncpa [#allocation3], 0  ;;  %s292_s0 = inlined_call_operand.vmem [shape: f32[8,128], index: 0, kind: input, shape index: {}]   ;;  %s293_s1 = inlined_call_operand.hbm [shape: f32[128,128], index: 1, kind: input, shape index: {}]   ;;  %s294_s2 = inlined_call_operand.vmem [shape: f32[1,128], index: 2, kind: input, shape index: {}]   ;;  %s295_s3 = inlined_call_operand.hbm [shape: f32[128,128], index: 3, kind: input, shape index: {}]   ;;  %s296_s4 = inlined_call_operand.vmem [shape: f32[1,128], index: 4, kind: input, shape index: {}]   ;;  %s297_s5 = inlined_call_operand.hbm [shape: f32[8,128], index: 5, kind: output, shape index: {}]  }
   0x1   :  { %11 = vsyncpa [#allocation6], 0 }
   0x2   :  { %12 = vsyncpa [#allocation4], 0  ;;  %s19_s20 = sshll.u32 %s293_s1, 4  ;;  %s239_s21 = smov [#allocation2]   ;;  %s20_s20 = int_to_ptr.hbm [resolvable:$true] %s19_s20 }
   0x3   :  { %s21_s22 = sshll.u32 %s239_s21, 4  ;;  %s34_s25 = sshll.u32 %s295_s3, 4  ;;  %s22_s22 = int_to_ptr.vmem [resolvable:$true] %s21_s22  ;;  %s35_s25 = int_to_ptr.hbm [resolvable:$true] %s34_s25 }
   0x4   :  { %s240_s26 = smov 128   ;;  %s241_s27 = smov 8  }
   0x5   :  { %27 = dma.hbm_to_vmem [thread:$0]  %s20_s20, 2048, %s22_s22, [#allocation3], %s240_s26, %s240_s26, %s241_s27  }
   0x6   :  { %s242_s28 = smov [#allocation5]  }
   0x7   :  { %s36_s29 = sshll.u32 %s242_s28, 4  ;;  %s37_s29 = int_to_ptr.vmem [resolvable:$true] %s36_s29 }
   0x8   :  { %42 = dma.hbm_to_vmem [thread:$0]  %s35_s25, 2048, %s37_s29, [#allocation6], %s240_s26, %s240_s26, %s241_s27  }
   0x9   :  { %233 = dma.done.wait [#allocation3], 2048  }
   0xa   :  { %234 = vsyncadd [#allocation3], 4294965248 }
   0xb   :  { %235 = dma.done.wait [#allocation6], 2048  }
   0xc   :  { %236 = vsyncadd [#allocation6], 4294965248  ;;  %v69_v0 = vld [vmem:[#allocation2 + $0x78] sm:$0xff]  ;;  %v68_v1 = vld [vmem:[#allocation2 + $0x70] sm:$0xff]  ;;  %s143_s12 = sshll.u32 %s297_s5, 4  ;;  %s144_s12 = int_to_ptr.hbm [resolvable:$true] %s143_s12 }
   0xd   :  { %74 = vmatpush.msra.mxu0 %v69_v0  ;;  %v67_v2 = vld [vmem:[#allocation2 + $0x68] sm:$0xff]  ;;  %v66_v3 = vld [vmem:[#allocation2 + $0x60] sm:$0xff]  ;;  %v110_v4 = vld [vmem:[#allocation5 + $0x78] sm:$0xff] }
   0xe   :  { %v65_v5 = vld [vmem:[#allocation2 + $0x58] sm:$0xff]  ;;  %115 = vmatpush.msra.mxu1 %v110_v4  ;;  %v109_v6 = vld [vmem:[#allocation5 + $0x70] sm:$0xff]  ;;  %v108_v7 = vld [vmem:[#allocation5 + $0x68] sm:$0xff] }
   0xf   :  { %75 = vmatpush.msra.mxu0 %v68_v1  ;;  %v64_v8 = vld [vmem:[#allocation2 + $0x50] sm:$0xff]  ;;  %v107_v9 = vld [vmem:[#allocation5 + $0x60] sm:$0xff]  ;;  %v63_v10 = vld [vmem:[#allocation2 + $0x48] sm:$0xff] }
  0x10   :  { %116 = vmatpush.msra.mxu1 %v109_v6  ;;  %v106_v11 = vld [vmem:[#allocation5 + $0x58] sm:$0xff]  ;;  %v62_v12 = vld [vmem:[#allocation2 + $0x40] sm:$0xff]  ;;  %v105_v13 = vld [vmem:[#allocation5 + $0x50] sm:$0xff] }
  0x11   :  { %76 = vmatpush.msra.mxu0 %v67_v2  ;;  %v61_v14 = vld [vmem:[#allocation2 + $0x38] sm:$0xff]  ;;  %v104_v15 = vld [vmem:[#allocation5 + $0x48] sm:$0xff]  ;;  %v60_v16 = vld [vmem:[#allocation2 + $0x30] sm:$0xff] }
  0x12   :  { %117 = vmatpush.msra.mxu1 %v108_v7  ;;  %v103_v17 = vld [vmem:[#allocation5 + $0x40] sm:$0xff]  ;;  %v59_v18 = vld [vmem:[#allocation2 + $0x28] sm:$0xff]  ;;  %v102_v19 = vld [vmem:[#allocation5 + $0x38] sm:$0xff] }
  0x13   :  { %77 = vmatpush.msra.mxu0 %v66_v3  ;;  %v58_v20 = vld [vmem:[#allocation2 + $0x20] sm:$0xff]  ;;  %v101_v21 = vld [vmem:[#allocation5 + $0x30] sm:$0xff]  ;;  %v57_v22 = vld [vmem:[#allocation2 + $0x18] sm:$0xff] }
  0x14   :  { %118 = vmatpush.msra.mxu1 %v107_v9  ;;  %v100_v23 = vld [vmem:[#allocation5 + $0x28] sm:$0xff]  ;;  %v56_v24 = vld [vmem:[#allocation2 + $0x10] sm:$0xff]  ;;  %v99_v25 = vld [vmem:[#allocation5 + $0x20] sm:$0xff] }
  0x15   :  { %78 = vmatpush.msra.mxu0 %v65_v5  ;;  %v55_v26 = vld [vmem:[#allocation2 + $0x8] sm:$0xff]  ;;  %v98_v27 = vld [vmem:[#allocation5 + $0x18] sm:$0xff]  ;;  %v54_v28 = vld [vmem:[#allocation2] sm:$0xff] }
  0x16   :  { %119 = vmatpush.msra.mxu1 %v106_v11  ;;  %v53_v29 = vld [vmem:[%s292_s0] sm:$0xff]  ;;  %v97_v30 = vld [vmem:[#allocation5 + $0x10] sm:$0xff]  ;;  %v96_v31 = vld [vmem:[#allocation5 + $0x8] sm:$0xff]  ;;  %s243_s0 = smov [#allocation7]  }
  0x17   :  { %79 = vmatpush.msra.mxu0 %v64_v8  ;;  %v95_v32 = vld [vmem:[#allocation5] sm:$0xff]  ;;  %s141_s9 = sshll.u32 %s243_s0, 4  ;;  %s142_s9 = int_to_ptr.vmem [resolvable:$true] %s141_s9 }
  0x18   :  { %120 = vmatpush.msra.mxu1 %v105_v13  ;;  %v159_v33 = vld [vmem:[%s294_s2] ss:$0 sm:$0xff] }
  0x19   :  { %80 = vmatpush.msra.mxu0 %v63_v10  ;;  %v160_v37 = vld [vmem:[%s296_s4] ss:$0 sm:$0xff] }
  0x1a   :  { %121 = vmatpush.msra.mxu1 %v104_v15 }
  0x1b   :  { %81 = vmatpush.msra.mxu0 %v62_v12 }
  0x1c   :  { %122 = vmatpush.msra.mxu1 %v103_v17 }
  0x1d   :  { %82 = vmatpush.msra.mxu0 %v61_v14 }
  0x1e   :  { %123 = vmatpush.msra.mxu1 %v102_v19 }
  0x1f   :  { %83 = vmatpush.msra.mxu0 %v60_v16 }
  0x20   :  { %124 = vmatpush.msra.mxu1 %v101_v21 }
  0x21   :  { %84 = vmatpush.msra.mxu0 %v59_v18 }
  0x22   :  { %125 = vmatpush.msra.mxu1 %v100_v23 }
  0x23   :  { %85 = vmatpush.msra.mxu0 %v58_v20 }
  0x24   :  { %126 = vmatpush.msra.mxu1 %v99_v25 }
  0x25   :  { %86 = vmatpush.msra.mxu0 %v57_v22 }
  0x26   :  { %127 = vmatpush.msra.mxu1 %v98_v27 }
  0x27   :  { %87 = vmatpush.msra.mxu0 %v56_v24 }
  0x28   :  { %128 = vmatpush.msra.mxu1 %v97_v30 }
  0x29   :  { %88 = vmatpush.msra.mxu0 %v55_v26 }
  0x2a   :  { %129 = vmatpush.msra.mxu1 %v96_v31 }
  0x2b   :  { %89 = vmatpush.msra.mxu0 %v54_v28 }
  0x2c   :  { %90 = vmatmul.f32.vlgmr.msra.gmra.mxu0 %v53_v29  ;;  %130 = vmatpush.msra.mxu1 %v95_v32 }
  0xa9   :  { %v91_v34 = vpop.f32.mrf.mxu0 }
  0xaa   :  { %v92_v35 = vadd.f32 %v159_v33, %v91_v34 }
  0xac   :  { %v94_v36 = vmax.f32 %v92_v35, 0.0 }
  0xae   :  { %131 = vmatmul.f32.vlgmr.msra.gmra.mxu1 %v94_v36 }
 0x12b   :  { %v132_v38 = vpop.f32.mrf.mxu1 }
 0x12c   :  { %v133_v39 = vadd.f32 %v160_v37, %v132_v38 }
 0x12e   :  { %135 = vst [vmem:[#allocation7] sm:$0xff] %v133_v39 }
 0x12f   :  { %146 = dma.vmem_to_hbm [thread:$0]  %s142_s9, 128, %s144_s12, [#allocation4]  }
 0x130   :  { %237 = dma.done.wait [#allocation4], 128  }
 0x131   :  { %238 = vsyncadd [#allocation4], 4294967168 }
 0x132   :  { %151 = vsyncpa [#allocation3], 1 }
 0x133   :  { %152 = vsyncpa [#allocation6], 1 }
 0x134   :  { %153 = vsyncpa [#allocation4], 1 }

</bundles_post_ra>
